<compile_context>
chip_gen: v6e
topology: v6e:2x2x1
jax: 0.10.0
libtpu: 0.0.40
codegen_flags: <defaults>
</compile_context>

<pallas_src>
import functools

import jax
import jax.numpy as jnp
from jax import lax
from jax.experimental import pallas as pl
from jax.experimental.pallas import tpu as pltpu

EPS = 1e-6
_HIGHEST = lax.Precision.HIGHEST  # final linear only (contraction dim = C <= 8, negligible cost)


def _round_up(x, m):
    return (x + m - 1) // m * m


def _vmem_budget():
    """(tile_budget_bytes, vmem_limit_bytes) derived from the chip's VMEM."""
    cap = 64 * 1024 * 1024  # conservative default (v7x physical VMEM per TC)
    try:
        info = pltpu.get_tpu_info()
        for attr in ("vmem_capacity_bytes", "vmem_bytes", "vmem_size_bytes"):
            v = getattr(info, attr, None)
            if v:
                cap = int(v)
                break
    except Exception:
        pass
    vmem_limit = max(32 * 1024 * 1024, min(cap, 128 * 1024 * 1024) - 16 * 1024 * 1024)
    tile_budget = vmem_limit // 2  # headroom for double-buffered I/O + compiler temps
    return tile_budget, vmem_limit


def _choose_tiles(C, CX, CY, O, N, M, budget_bytes):
    """Largest lane-dense (NT, MT) whose hot intermediates fit the budget."""
    m_cap = _round_up(M, 128)
    n_cap = _round_up(N, 128)
    mts = [t for t in (1024, 512, 256, 128) if t <= m_cap] or [128]
    nts = [t for t in (512, 256, 128) if t <= n_cap] or [128]
    for mt in mts:          # prefer large M tiles (lane-dense stores, step amortization)
        for nt in nts:
            hot = (2 * C + CX) * nt * mt * 4          # dsq + wt + y*wt (f32)
            io = 8 * (CX * (nt + mt) + CY * nt + (O + 3 * C) * mt)  # dbl-buffered blocks
            scr = 2 * C * mt * 4                       # h0/h1 accumulators
            if hot + io + scr <= budget_bytes:
                return nt, mt
    return 128, 128


def _convdeepset_kernel(n_valid, coef_ref, x1_ref, x2_ref, y_ref,
                        w0_ref, w1_ref, b_ref,
                        out_ref, nh1_ref, h1_ref, h0_ref,
                        h0_acc, h1_acc):
    # coef_ref: (C//CX, CX)   -0.5 / (exp(sigma)+eps)^2, reshaped channel-major
    # x1_ref  : (1, CX, NT)   context_x tile, channel-first
    # x2_ref  : (1, CX, MT)   x_grid tile, channel-first
    # y_ref   : (1, CY, NT)   context_y tile, channel-first
    # w0_ref  : (O, C)  w1_ref: (O, C)  b_ref: (O, 1)
    # outputs : (1, O/C, MT)  channel-first; scratch h0_acc/h1_acc: (C, MT) f32
    n_idx = pl.program_id(2)
    n_last = pl.num_programs(2) - 1

    @pl.when(n_idx == 0)
    def _():
        h0_acc[...] = jnp.zeros_like(h0_acc)
        h1_acc[...] = jnp.zeros_like(h1_acc)

    coef = coef_ref[...]                      # (factors, CX)
    x1 = x1_ref[0]                            # (CX, NT)
    x2 = x2_ref[0]                            # (CX, MT)
    y = y_ref[0]                              # (CY, NT)

    factors, CX = coef.shape
    NT = x1.shape[1]
    MT = x2.shape[1]
    CY = y.shape[0]
    C = factors * CX

    # Squared pairwise distances per raw coordinate channel: (CX, NT, MT).
    d = x1[:, :, None] - x2[:, None, :]
    dsq = d * d
    # wt[f, cx, n, m] = exp(coef[f, cx] * dsq[cx, n, m])  -- channel c = f*CX + cx,
    # i.e. torch's dists.repeat(1,1,1,factors) semantics without materializing a tile.
    wt = jnp.exp(coef[:, :, None, None] * dsq[None])       # (factors, CX, NT, MT)

    if n_valid % NT != 0:
        # Exact masking of padded context rows (only the last N tile is ragged).
        row = jax.lax.broadcasted_iota(jnp.int32, (NT, MT), 0) + n_idx * NT
        wt = jnp.where((row < n_valid)[None, None], wt, 0.0)

    # context_y tiled/broadcast to C channels (torch repeat semantics), tiny (C, NT).
    if CY * factors == C:
        y_rep = jnp.tile(y, (factors, 1)) if factors > 1 else y
    elif CY == 1:
        y_rep = jnp.broadcast_to(y, (C, NT))
    else:
        y_rep = jnp.tile(y, (C // CY, 1))
    y4 = y_rep.reshape(factors, CX, NT)

    # VPU/XLU reductions over the context points (EUP exp is the binding unit).
    h0_acc[...] += jnp.sum(wt, axis=2).reshape(C, MT)
    h1_acc[...] += jnp.sum(y4[:, :, :, None] * wt, axis=2).reshape(C, MT)

    @pl.when(n_idx == n_last)
    def _():
        h0 = h0_acc[...]
        h1 = h1_acc[...]
        n_h1 = h1 * pl.reciprocal(h0 + EPS, approx=False)
        # Point-wise Linear without the concat: W[:, :C] @ h0 + W[:, C:] @ n_h1 + b.
        out = (jnp.dot(w0_ref[...], h0, preferred_element_type=jnp.float32,
                       precision=_HIGHEST)
               + jnp.dot(w1_ref[...], n_h1, preferred_element_type=jnp.float32,
                         precision=_HIGHEST)
               + b_ref[...])                                   # (O, MT)
        out_ref[0] = out.astype(out_ref.dtype)
        nh1_ref[0] = n_h1.astype(nh1_ref.dtype)
        h1_ref[0] = h1.astype(h1_ref.dtype)
        h0_ref[0] = h0.astype(h0_ref.dtype)


def conv_deep_set_forward(context_x, context_y, x_grid, sigma, weight, bias,
                          channels_last=True):
    """Pallas implementation of ConvDeepSet.forward.

    Returns (y_out, n_h1, h1, h0); channel-last (torch convention) by default,
    channel-first (B, C, M) if channels_last=False (skips the transposes).
    """
    B, N, CX = context_x.shape
    M = x_grid.shape[1]
    CY = context_y.shape[2]
    C = sigma.shape[0]                      # in_channels
    O = weight.shape[0]                     # out_channels
    factors = C // CX

    tile_budget, vmem_limit = _vmem_budget()
    NT, MT = _choose_tiles(C, CX, CY, O, N, M, tile_budget)
    N_pad = _round_up(N, NT)
    M_pad = _round_up(M, MT)

    # Channel-first (lane-dense) layouts for the kernel, padded to the tiles.
    x1t = jnp.transpose(context_x, (0, 2, 1)).astype(jnp.float32)   # (B, CX, N)
    x2t = jnp.transpose(x_grid, (0, 2, 1)).astype(jnp.float32)      # (B, CX, M)
    yt = jnp.transpose(context_y, (0, 2, 1)).astype(jnp.float32)    # (B, CY, N)
    if N_pad != N:
        x1t = jnp.pad(x1t, ((0, 0), (0, 0), (0, N_pad - N)))
        yt = jnp.pad(yt, ((0, 0), (0, 0), (0, N_pad - N)))
    if M_pad != M:
        x2t = jnp.pad(x2t, ((0, 0), (0, 0), (0, M_pad - M)))

    scale = jnp.exp(sigma).astype(jnp.float32) + EPS                # exp(sigma)+eps
    coef = (-0.5 / (scale * scale)).reshape(factors, CX)

    w = weight.astype(jnp.float32)                                  # (O, 2C)
    w0 = w[:, :C]
    w1 = w[:, C:]
    b2 = bias.astype(jnp.float32).reshape(O, 1)

    grid = (B, M_pad // MT, N_pad // NT)
    kernel = functools.partial(_convdeepset_kernel, N)

    grid_spec = pltpu.PrefetchScalarGridSpec(
        num_scalar_prefetch=0,
        grid=grid,
        in_specs=[
            pl.BlockSpec((factors, CX), lambda b, m, n: (0, 0)),     # coef
            pl.BlockSpec((1, CX, NT), lambda b, m, n: (b, 0, n)),    # context_x tile
            pl.BlockSpec((1, CX, MT), lambda b, m, n: (b, 0, m)),    # x_grid tile
            pl.BlockSpec((1, CY, NT), lambda b, m, n: (b, 0, n)),    # context_y tile
            pl.BlockSpec((O, C), lambda b, m, n: (0, 0)),            # W[:, :C]
            pl.BlockSpec((O, C), lambda b, m, n: (0, 0)),            # W[:, C:]
            pl.BlockSpec((O, 1), lambda b, m, n: (0, 0)),            # bias
        ],
        out_specs=[
            pl.BlockSpec((1, O, MT), lambda b, m, n: (b, 0, m)),     # y_out (chan-first)
            pl.BlockSpec((1, C, MT), lambda b, m, n: (b, 0, m)),     # n_h1
            pl.BlockSpec((1, C, MT), lambda b, m, n: (b, 0, m)),     # h1
            pl.BlockSpec((1, C, MT), lambda b, m, n: (b, 0, m)),     # h0
        ],
        scratch_shapes=[
            pltpu.VMEM((C, MT), jnp.float32),                        # h0 accumulator
            pltpu.VMEM((C, MT), jnp.float32),                        # h1 accumulator
        ],
    )

    out_shapes = (
        jax.ShapeDtypeStruct((B, O, M_pad), jnp.float32),
        jax.ShapeDtypeStruct((B, C, M_pad), jnp.float32),
        jax.ShapeDtypeStruct((B, C, M_pad), jnp.float32),
        jax.ShapeDtypeStruct((B, C, M_pad), jnp.float32),
    )

    y_out_t, n_h1_t, h1_t, h0_t = pl.pallas_call(
        kernel,
        out_shape=out_shapes,
        grid_spec=grid_spec,
        compiler_params=pltpu.CompilerParams(
            dimension_semantics=("parallel", "parallel", "arbitrary"),
            vmem_limit_bytes=int(vmem_limit)),
    )(coef, x1t, x2t, yt, w0, w1, b2)

    # Drop the padded grid columns.
    y_out_t = y_out_t[:, :, :M]
    n_h1_t = n_h1_t[:, :, :M]
    h1_t = h1_t[:, :, :M]
    h0_t = h0_t[:, :, :M]

    if not channels_last:
        return y_out_t, n_h1_t, h1_t, h0_t

    # Back to the torch channel-last convention.
    return (jnp.transpose(y_out_t, (0, 2, 1)),
            jnp.transpose(n_h1_t, (0, 2, 1)),
            jnp.transpose(h1_t, (0, 2, 1)),
            jnp.transpose(h0_t, (0, 2, 1)))


def _reference(context_x, context_y, x_grid, sigma, weight, bias):
    """Plain-JAX transcription of the torch forward (for verification)."""
    C = sigma.shape[0]
    scales = jnp.exp(sigma)[None, None, None, :]
    dists = context_x[:, :, None, :] - x_grid[:, None, :, :]
    factors = 1
    if dists.shape[-1] != C:
        factors = C // dists.shape[-1]
        dists = jnp.tile(dists, (1, 1, 1, factors))
    dists = dists / (scales + EPS)
    wt = jnp.exp(-0.5 * dists ** 2)
    h0 = wt.sum(axis=1)
    if factors > 1:
        context_y = jnp.tile(context_y, (1, 1, factors))
    h1 = (context_y[:, :, None, :] * wt).sum(axis=1)
    n_h1 = h1 / (h0 + EPS)
    y_out = jnp.concatenate([h0, n_h1], axis=-1).reshape(-1, 2 * C)
    y_out = y_out @ weight.T + bias
    y_out = y_out.reshape(context_x.shape[0], -1, weight.shape[0])
    return y_out, n_h1, h1, h0


if __name__ == "__main__":
    key = jax.random.PRNGKey(0)
    kx, ky, kt, kw = jax.random.split(key, 4)

    # Shapes implied by Convcnp: x is (B, N, 1), y is (B, N, 1), grid (B, M, 1);
    # encoder = ConvDeepSet(in_channels=num_channels=3, out_channels=8).
    B, N, M = 2, 8, 16
    in_channels, out_channels = 3, 8          # factors = in_channels // 1 = 3

    context_x = jax.random.uniform(kx, (B, N, 1), jnp.float32, -2.0, 2.0)
    context_y = jax.random.normal(ky, (B, N, 1), jnp.float32)
    x_grid = jax.random.uniform(kt, (B, M, 1), jnp.float32, -2.0, 2.0)

    # Deterministic parameter init (matches module __init__ shapes):
    #   sigma = log(min_init_lengthscale + init_lengthscale * ones(in_channels))
    #   g = Linear(2*in_channels, out_channels), xavier-normal weight, zero bias
    sigma = jnp.log(1e-6 + 1.0 * jnp.ones((in_channels,), jnp.float32))
    xavier_std = (2.0 / (2 * in_channels + out_channels)) ** 0.5
    weight = xavier_std * jax.random.normal(
        kw, (out_channels, 2 * in_channels), jnp.float32)
    bias = jnp.zeros((out_channels,), jnp.float32)

    outs = conv_deep_set_forward(context_x, context_y, x_grid, sigma, weight, bias)
    outs = jax.block_until_ready(outs)

    refs = _reference(context_x, context_y, x_grid, sigma, weight, bias)
    names = ("y_out", "n_h1", "h1", "h0")
    for name, a, r in zip(names, outs, refs):
        assert a.shape == r.shape, (name, a.shape, r.shape)
        assert jnp.allclose(a, r, rtol=1e-4, atol=1e-4), name

    print("KERNEL_OK")
</pallas_src>

<mosaic_0001>
module attributes {stable_mosaic.version = 11 : i64} {
  func.func @_convdeepset_kernel(%arg0: i32, %arg1: i32, %arg2: i32, %arg3: memref<3x1xf32, #tpu.memory_space<vmem>>, %arg4: memref<1x1x128xf32, #tpu.memory_space<vmem>>, %arg5: memref<1x1x128xf32, #tpu.memory_space<vmem>>, %arg6: memref<1x1x128xf32, #tpu.memory_space<vmem>>, %arg7: memref<8x3xf32, #tpu.memory_space<vmem>>, %arg8: memref<8x3xf32, #tpu.memory_space<vmem>>, %arg9: memref<8x1xf32, #tpu.memory_space<vmem>>, %arg10: memref<1x8x128xf32, #tpu.memory_space<vmem>>, %arg11: memref<1x3x128xf32, #tpu.memory_space<vmem>>, %arg12: memref<1x3x128xf32, #tpu.memory_space<vmem>>, %arg13: memref<1x3x128xf32, #tpu.memory_space<vmem>>, %arg14: memref<3x128xf32, #tpu.memory_space<vmem>>, %arg15: memref<3x128xf32, #tpu.memory_space<vmem>>) attributes {dimension_semantics = [#tpu.dimension_semantics<parallel>, #tpu.dimension_semantics<parallel>, #tpu.dimension_semantics<arbitrary>], iteration_bounds = array<i64: 2, 1, 1>, scalar_prefetch = 0 : i64, scratch_operands = 2 : i64, tpu.core_type = #tpu.core_type<tc>, window_params = [{pipeline_mode = #tpu.pipeline_mode<synchronous>, transform_indices = @transform_0, window_bounds = array<i64: 3, 1>}, {transform_indices = @transform_1, window_bounds = array<i64: 1, 1, 128>}, {transform_indices = @transform_2, window_bounds = array<i64: 1, 1, 128>}, {transform_indices = @transform_3, window_bounds = array<i64: 1, 1, 128>}, {pipeline_mode = #tpu.pipeline_mode<synchronous>, transform_indices = @transform_4, window_bounds = array<i64: 8, 3>}, {pipeline_mode = #tpu.pipeline_mode<synchronous>, transform_indices = @transform_5, window_bounds = array<i64: 8, 3>}, {pipeline_mode = #tpu.pipeline_mode<synchronous>, transform_indices = @transform_6, window_bounds = array<i64: 8, 1>}, {transform_indices = @transform_7, window_bounds = array<i64: 1, 8, 128>}, {transform_indices = @transform_8, window_bounds = array<i64: 1, 3, 128>}, {transform_indices = @transform_9, window_bounds = array<i64: 1, 3, 128>}, {transform_indices = @transform_10, window_bounds = array<i64: 1, 3, 128>}]} {
    %c0_i32 = arith.constant 0 : i32
    %0 = arith.cmpi eq, %arg2, %c0_i32 : i32
    %1 = arith.extui %0 : i1 to i32
    %c0_i32_0 = arith.constant 0 : i32
    %2 = arith.cmpi ne, %1, %c0_i32_0 : i32
    scf.if %2 {
      %cst_23 = arith.constant 0.000000e+00 : f32
      %51 = vector.broadcast %cst_23 : f32 to vector<3x128xf32>
      %c0_24 = arith.constant 0 : index
      %c0_25 = arith.constant 0 : index
      %52 = vector.load %arg14[%c0_24, %c0_25] : memref<3x128xf32, #tpu.memory_space<vmem>>, vector<3x128xf32>
      tpu.vector_store %arg14[%c0_24, %c0_25], %51 {strides = array<i32>} : memref<3x128xf32, #tpu.memory_space<vmem>>, vector<3x128xf32>,
      %cst_26 = arith.constant 0.000000e+00 : f32
      %53 = vector.broadcast %cst_26 : f32 to vector<3x128xf32>
      %c0_27 = arith.constant 0 : index
      %c0_28 = arith.constant 0 : index
      %54 = vector.load %arg15[%c0_27, %c0_28] : memref<3x128xf32, #tpu.memory_space<vmem>>, vector<3x128xf32>
      tpu.vector_store %arg15[%c0_27, %c0_28], %53 {strides = array<i32>} : memref<3x128xf32, #tpu.memory_space<vmem>>, vector<3x128xf32>,
    } else {
    }
    %c0 = arith.constant 0 : index
    %c0_1 = arith.constant 0 : index
    %3 = vector.load %arg3[%c0, %c0_1] : memref<3x1xf32, #tpu.memory_space<vmem>>, vector<3x1xf32>
    %c0_2 = arith.constant 0 : index
    %c0_3 = arith.constant 0 : index
    %c0_4 = arith.constant 0 : index
    %4 = vector.load %arg4[%c0_2, %c0_3, %c0_4] : memref<1x1x128xf32, #tpu.memory_space<vmem>>, vector<1x1x128xf32>
    %5 = vector.shape_cast %4 : vector<1x1x128xf32> to vector<1x128xf32>
    %c0_5 = arith.constant 0 : index
    %c0_6 = arith.constant 0 : index
    %c0_7 = arith.constant 0 : index
    %6 = vector.load %arg5[%c0_5, %c0_6, %c0_7] : memref<1x1x128xf32, #tpu.memory_space<vmem>>, vector<1x1x128xf32>
    %7 = vector.shape_cast %6 : vector<1x1x128xf32> to vector<1x128xf32>
    %c0_8 = arith.constant 0 : index
    %c0_9 = arith.constant 0 : index
    %c0_10 = arith.constant 0 : index
    %8 = vector.load %arg6[%c0_8, %c0_9, %c0_10] : memref<1x1x128xf32, #tpu.memory_space<vmem>>, vector<1x1x128xf32>
    %9 = vector.shape_cast %8 : vector<1x1x128xf32> to vector<1x128xf32>
    %10 = vector.shape_cast %5 : vector<1x128xf32> to vector<1x128x1xf32>
    %11 = vector.shape_cast %7 : vector<1x128xf32> to vector<1x1x128xf32>
    %12 = vector.broadcast %10 : vector<1x128x1xf32> to vector<1x128x128xf32>
    %13 = vector.broadcast %11 : vector<1x1x128xf32> to vector<1x128x128xf32>
    %14 = arith.subf %12, %13 : vector<1x128x128xf32>
    %15 = arith.mulf %14, %14 : vector<1x128x128xf32>
    %16 = vector.shape_cast %3 : vector<3x1xf32> to vector<3x1x1x1xf32>
    %17 = vector.shape_cast %15 : vector<1x128x128xf32> to vector<1x1x128x128xf32>
    %18 = vector.broadcast %16 : vector<3x1x1x1xf32> to vector<3x1x128x128xf32>
    %19 = vector.broadcast %17 : vector<1x1x128x128xf32> to vector<3x1x128x128xf32>
    %20 = arith.mulf %18, %19 : vector<3x1x128x128xf32>
    %21 = math.exp %20 : vector<3x1x128x128xf32>
    %22 = tpu.iota {dimensions = array<i32: 0>} : vector<128x128xi32>
    %c128_i32 = arith.constant 128 : i32
    %23 = arith.muli %arg2, %c128_i32 : i32
    %24 = vector.broadcast %23 : i32 to vector<128x128xi32>
    %25 = arith.addi %22, %24 : vector<128x128xi32>
    %c8_i32 = arith.constant 8 : i32
    %26 = vector.broadcast %c8_i32 : i32 to vector<128x128xi32>
    %27 = arith.cmpi slt, %25, %26 : vector<128x128xi32>
    %28 = vector.shape_cast %27 : vector<128x128xi1> to vector<1x1x128x128xi1>
    %cst = arith.constant 0.000000e+00 : f32
    %29 = vector.shape_cast %28 : vector<1x1x128x128xi1> to vector<1x1x128x128xi1>
    %30 = vector.broadcast %29 : vector<1x1x128x128xi1> to vector<3x1x128x128xi1>
    %31 = vector.broadcast %cst : f32 to vector<3x1x128x128xf32>
    %32 = arith.select %30, %21, %31 : vector<3x1x128x128xi1>, vector<3x1x128x128xf32>
    %33 = tpu.concatenate %9, %9, %9 in 0 : vector<1x128xf32>, vector<1x128xf32>, vector<1x128xf32> -> vector<3x128xf32>
    %34 = vector.shape_cast %33 : vector<3x128xf32> to vector<3x1x128xf32>
    %c0_11 = arith.constant 0 : index
    %c0_12 = arith.constant 0 : index
    %35 = vector.load %arg14[%c0_11, %c0_12] : memref<3x128xf32, #tpu.memory_space<vmem>>, vector<3x128xf32>
    %cst_13 = arith.constant dense<0.000000e+00> : vector<3x1x128xf32>
    %36 = vector.multi_reduction <add>, %32, %cst_13 [2] : vector<3x1x128x128xf32> to vector<3x1x128xf32>
    %37 = vector.shape_cast %36 : vector<3x1x128xf32> to vector<3x128xf32>
    %38 = arith.addf %35, %37 : vector<3x128xf32>
    %c0_14 = arith.constant 0 : index
    %c0_15 = arith.constant 0 : index
    %39 = vector.load %arg14[%c0_14, %c0_15] : memref<3x128xf32, #tpu.memory_space<vmem>>, vector<3x128xf32>
    tpu.vector_store %arg14[%c0_14, %c0_15], %38 {strides = array<i32>} : memref<3x128xf32, #tpu.memory_space<vmem>>, vector<3x128xf32>,
    %c0_16 = arith.constant 0 : index
    %c0_17 = arith.constant 0 : index
    %40 = vector.load %arg15[%c0_16, %c0_17] : memref<3x128xf32, #tpu.memory_space<vmem>>, vector<3x128xf32>
    %41 = vector.shape_cast %34 : vector<3x1x128xf32> to vector<3x1x128x1xf32>
    %42 = vector.broadcast %41 : vector<3x1x128x1xf32> to vector<3x1x128x128xf32>
    %43 = arith.mulf %42, %32 : vector<3x1x128x128xf32>
    %cst_18 = arith.constant dense<0.000000e+00> : vector<3x1x128xf32>
    %44 = vector.multi_reduction <add>, %43, %cst_18 [2] : vector<3x1x128x128xf32> to vector<3x1x128xf32>
    %45 = vector.shape_cast %44 : vector<3x1x128xf32> to vector<3x128xf32>
    %46 = arith.addf %40, %45 : vector<3x128xf32>
    %c0_19 = arith.constant 0 : index
    %c0_20 = arith.constant 0 : index
    %47 = vector.load %arg15[%c0_19, %c0_20] : memref<3x128xf32, #tpu.memory_space<vmem>>, vector<3x128xf32>
    tpu.vector_store %arg15[%c0_19, %c0_20], %46 {strides = array<i32>} : memref<3x128xf32, #tpu.memory_space<vmem>>, vector<3x128xf32>,
    %c0_i32_21 = arith.constant 0 : i32
    %48 = arith.cmpi eq, %arg2, %c0_i32_21 : i32
    %49 = arith.extui %48 : i1 to i32
    %c0_i32_22 = arith.constant 0 : i32
    %50 = arith.cmpi ne, %49, %c0_i32_22 : i32
    scf.if %50 {
      %c0_23 = arith.constant 0 : index
      %c0_24 = arith.constant 0 : index
      %51 = vector.load %arg14[%c0_23, %c0_24] : memref<3x128xf32, #tpu.memory_space<vmem>>, vector<3x128xf32>
      %c0_25 = arith.constant 0 : index
      %c0_26 = arith.constant 0 : index
      %52 = vector.load %arg15[%c0_25, %c0_26] : memref<3x128xf32, #tpu.memory_space<vmem>>, vector<3x128xf32>
      %cst_27 = arith.constant 9.99999997E-7 : f32
      %53 = vector.broadcast %cst_27 : f32 to vector<3x128xf32>
      %54 = arith.addf %51, %53 : vector<3x128xf32>
      %55 = tpu.reciprocal %54 : vector<3x128xf32> -> vector<3x128xf32>
      %56 = arith.mulf %52, %55 : vector<3x128xf32>
      %c0_28 = arith.constant 0 : index
      %c0_29 = arith.constant 0 : index
      %57 = vector.load %arg7[%c0_28, %c0_29] : memref<8x3xf32, #tpu.memory_space<vmem>>, vector<8x3xf32>
      %cst_30 = arith.constant dense<0.000000e+00> : vector<8x128xf32>
      %58 = tpu.matmul %57, %51, %cst_30 {dimension_numbers = #tpu.dot_dimension_numbers<[1], [0], [0], [1], [0, 0, 1, 1], [], []>, precision = #tpu.contract_precision<fp32>} : vector<8x3xf32>, vector<3x128xf32>, vector<8x128xf32> -> vector<8x128xf32>
      %c0_31 = arith.constant 0 : index
      %c0_32 = arith.constant 0 : index
      %59 = vector.load %arg8[%c0_31, %c0_32] : memref<8x3xf32, #tpu.memory_space<vmem>>, vector<8x3xf32>
      %cst_33 = arith.constant dense<0.000000e+00> : vector<8x128xf32>
      %60 = tpu.matmul %59, %56, %cst_33 {dimension_numbers = #tpu.dot_dimension_numbers<[1], [0], [0], [1], [0, 0, 1, 1], [], []>, precision = #tpu.contract_precision<fp32>} : vector<8x3xf32>, vector<3x128xf32>, vector<8x128xf32> -> vector<8x128xf32>
      %61 = arith.addf %58, %60 : vector<8x128xf32>
      %c0_34 = arith.constant 0 : index
      %c0_35 = arith.constant 0 : index
      %62 = vector.load %arg9[%c0_34, %c0_35] : memref<8x1xf32, #tpu.memory_space<vmem>>, vector<8x1xf32>
      %63 = vector.broadcast %62 : vector<8x1xf32> to vector<8x128xf32>
      %64 = arith.addf %61, %63 : vector<8x128xf32>
      %c0_36 = arith.constant 0 : index
      %c0_37 = arith.constant 0 : index
      %c0_38 = arith.constant 0 : index
      %65 = vector.load %arg10[%c0_36, %c0_37, %c0_38] : memref<1x8x128xf32, #tpu.memory_space<vmem>>, vector<1x8x128xf32>
      %66 = vector.shape_cast %65 : vector<1x8x128xf32> to vector<8x128xf32>
      %67 = vector.shape_cast %64 : vector<8x128xf32> to vector<1x8x128xf32>
      tpu.vector_store %arg10[%c0_36, %c0_37, %c0_38], %67 {strides = array<i32>} : memref<1x8x128xf32, #tpu.memory_space<vmem>>, vector<1x8x128xf32>,
      %c0_39 = arith.constant 0 : index
      %c0_40 = arith.constant 0 : index
      %c0_41 = arith.constant 0 : index
      %68 = vector.load %arg11[%c0_39, %c0_40, %c0_41] : memref<1x3x128xf32, #tpu.memory_space<vmem>>, vector<1x3x128xf32>
      %69 = vector.shape_cast %68 : vector<1x3x128xf32> to vector<3x128xf32>
      %70 = vector.shape_cast %56 : vector<3x128xf32> to vector<1x3x128xf32>
      tpu.vector_store %arg11[%c0_39, %c0_40, %c0_41], %70 {strides = array<i32>} : memref<1x3x128xf32, #tpu.memory_space<vmem>>, vector<1x3x128xf32>,
      %c0_42 = arith.constant 0 : index
      %c0_43 = arith.constant 0 : index
      %c0_44 = arith.constant 0 : index
      %71 = vector.load %arg12[%c0_42, %c0_43, %c0_44] : memref<1x3x128xf32, #tpu.memory_space<vmem>>, vector<1x3x128xf32>
      %72 = vector.shape_cast %71 : vector<1x3x128xf32> to vector<3x128xf32>
      %73 = vector.shape_cast %52 : vector<3x128xf32> to vector<1x3x128xf32>
      tpu.vector_store %arg12[%c0_42, %c0_43, %c0_44], %73 {strides = array<i32>} : memref<1x3x128xf32, #tpu.memory_space<vmem>>, vector<1x3x128xf32>,
      %c0_45 = arith.constant 0 : index
      %c0_46 = arith.constant 0 : index
      %c0_47 = arith.constant 0 : index
      %74 = vector.load %arg13[%c0_45, %c0_46, %c0_47] : memref<1x3x128xf32, #tpu.memory_space<vmem>>, vector<1x3x128xf32>
      %75 = vector.shape_cast %74 : vector<1x3x128xf32> to vector<3x128xf32>
      %76 = vector.shape_cast %51 : vector<3x128xf32> to vector<1x3x128xf32>
      tpu.vector_store %arg13[%c0_45, %c0_46, %c0_47], %76 {strides = array<i32>} : memref<1x3x128xf32, #tpu.memory_space<vmem>>, vector<1x3x128xf32>,
    } else {
    }
    return
  }
  func.func @transform_0(%arg0: i32, %arg1: i32, %arg2: i32) -> (i32, i32) {
    %c0_i32 = arith.constant 0 : i32
    %c0_i32_0 = arith.constant 0 : i32
    %c0_i32_1 = arith.constant 0 : i32
    return %c0_i32, %c0_i32_0 : i32, i32
  }
  func.func @transform_1(%arg0: i32, %arg1: i32, %arg2: i32) -> (i32, i32, i32) {
    %c0_i32 = arith.constant 0 : i32
    %c0_i32_0 = arith.constant 0 : i32
    return %arg0, %c0_i32, %arg2 : i32, i32, i32
  }
  func.func @transform_2(%arg0: i32, %arg1: i32, %arg2: i32) -> (i32, i32, i32) {
    %c0_i32 = arith.constant 0 : i32
    %c0_i32_0 = arith.constant 0 : i32
    return %arg0, %c0_i32, %arg1 : i32, i32, i32
  }
  func.func @transform_3(%arg0: i32, %arg1: i32, %arg2: i32) -> (i32, i32, i32) {
    %c0_i32 = arith.constant 0 : i32
    %c0_i32_0 = arith.constant 0 : i32
    return %arg0, %c0_i32, %arg2 : i32, i32, i32
  }
  func.func @transform_4(%arg0: i32, %arg1: i32, %arg2: i32) -> (i32, i32) {
    %c0_i32 = arith.constant 0 : i32
    %c0_i32_0 = arith.constant 0 : i32
    %c0_i32_1 = arith.constant 0 : i32
    return %c0_i32, %c0_i32_0 : i32, i32
  }
  func.func @transform_5(%arg0: i32, %arg1: i32, %arg2: i32) -> (i32, i32) {
    %c0_i32 = arith.constant 0 : i32
    %c0_i32_0 = arith.constant 0 : i32
    %c0_i32_1 = arith.constant 0 : i32
    return %c0_i32, %c0_i32_0 : i32, i32
  }
  func.func @transform_6(%arg0: i32, %arg1: i32, %arg2: i32) -> (i32, i32) {
    %c0_i32 = arith.constant 0 : i32
    %c0_i32_0 = arith.constant 0 : i32
    %c0_i32_1 = arith.constant 0 : i32
    return %c0_i32, %c0_i32_0 : i32, i32
  }
  func.func @transform_7(%arg0: i32, %arg1: i32, %arg2: i32) -> (i32, i32, i32) {
    %c0_i32 = arith.constant 0 : i32
    %c0_i32_0 = arith.constant 0 : i32
    return %arg0, %c0_i32, %arg1 : i32, i32, i32
  }
  func.func @transform_8(%arg0: i32, %arg1: i32, %arg2: i32) -> (i32, i32, i32) {
    %c0_i32 = arith.constant 0 : i32
    %c0_i32_0 = arith.constant 0 : i32
    return %arg0, %c0_i32, %arg1 : i32, i32, i32
  }
  func.func @transform_9(%arg0: i32, %arg1: i32, %arg2: i32) -> (i32, i32, i32) {
    %c0_i32 = arith.constant 0 : i32
    %c0_i32_0 = arith.constant 0 : i32
    return %arg0, %c0_i32, %arg1 : i32, i32, i32
  }
  func.func @transform_10(%arg0: i32, %arg1: i32, %arg2: i32) -> (i32, i32, i32) {
    %c0_i32 = arith.constant 0 : i32
    %c0_i32_0 = arith.constant 0 : i32
    return %arg0, %c0_i32, %arg1 : i32, i32, i32
  }
}

</mosaic_0001>

<bundles_post_ra>
// kernel: tpu_custom_call.1
= control target key start
LH: loop header
LB: loop body
LE: loop exit
PB: predicated region body
PF: predicated region fallthrough
CT: control target
= control target key end

     0   :  { %s3000_s0 = inlined_call_operand.vmem [shape: f32[3,1], index: 0, kind: input, shape index: {}]   ;;  %s3001_s1 = inlined_call_operand.vmem [shape: f32[2,1,128], index: 1, kind: input, shape index: {}]   ;;  %s3002_s2 = inlined_call_operand.vmem [shape: f32[2,1,128], index: 2, kind: input, shape index: {}]   ;;  %s3003_s3 = inlined_call_operand.vmem [shape: f32[2,1,128], index: 3, kind: input, shape index: {}]   ;;  %s3004_s4 = inlined_call_operand.vmem [shape: f32[8,3], index: 4, kind: input, shape index: {}]   ;;  %s3005_s5 = inlined_call_operand.vmem [shape: f32[8,3], index: 5, kind: input, shape index: {}]   ;;  %s3006_s6 = inlined_call_operand.vmem [shape: f32[8,1], index: 6, kind: input, shape index: {}]   ;;  %s3007_s7 = inlined_call_operand.hbm [shape: f32[2,8,128], index: 7, kind: output, shape index: {0}]   ;;  %s3008_s8 = inlined_call_operand.vmem [shape: f32[2,3,128], index: 8, kind: output, shape index: {1}]   ;;  %s3009_s9 = inlined_call_operand.vmem [shape: f32[2,3,128], index: 9, kind: output, shape index: {2}]   ;;  %s3010_s10 = inlined_call_operand.vmem [shape: f32[2,3,128], index: 10, kind: output, shape index: {3}]  }
   0x1   :  { %3011 = sst [smem:[#allocation7_spill]] %s3000_s0 }
   0x2   :  { %3012 = sst [smem:[#allocation8_spill]] %s3001_s1 }
   0x3   :  { %16 = vsyncpa [#allocation5], 0 }
   0x4   :  { %18 = vsyncpa [#allocation5 + $0x1], 0  ;;  %s2799_s13 = smov 0   ;;  %s2801_s14 = smov 0  }
   0x5   :  { %s2803_s15 = smov 0   ;;  %s2805_s16 = smov 0  }
   0x6   :  { %s2807_s17 = smov 0   ;;  %s2809_s18 = smov 0  }
   0x7 LB: > { %s2492_s19 = sadd.s32 4294967295, %s2737_s18   ;;  %s2493_s20 = sadd.s32 4294967294, %s2737_s18   ;;  %s2737_s18 = sphi %s2809_s18, %s24_s18   ;;  %s2733_s17 = sphi %s2807_s17, %s3021_s17   ;;  %s2729_s16 = sphi %s2805_s16, %s3020_s16   ;;  %s2725_s15 = sphi %s2803_s15, %s3019_s15   ;;  %s2721_s14 = sphi %s2801_s14, %s3018_s14   ;;  %s2717_s13 = sphi %s2799_s13, %s3017_s13  }
   0x8   : > { %s43_s21 = sadd.s32 1, %s2733_s17  ;;  %s220_s22 = sadd.s32 1, %s2725_s15 }
   0x9   : > { %p45_p0 = scmp.ge.s32.totalorder %s43_s21, 2  ;;  %p230_p1 = scmp.ne.s32.totalorder %s2725_s15, %s2721_s14 }
   0xa   : > { %p231_p2 = scmp.eq.s32.totalorder %s2492_s19, 1  ;;  %p236_p3 = scmp.ne.s32.totalorder %s2721_s14, %s2717_s13 }
   0xb   : > { %s3023_s21 = smov (%p45_p0, %s43_s21), 0  ;;  %p237_p5 = scmp.eq.s32.totalorder %s2493_s20, 1 }
   0xc   : > { %p2839_p4 = por %p231_p2, %p230_p1  ;;  %s215_s24 = ssub.s32 %s2733_s17, %s3023_s21 }
   0xd   : > { %p2496_p6 = scmp.ge.s32.totalorder %s2737_s18, 1  ;;  %p218_p7 = scmp.eq.s32.totalorder %s215_s24, 0 }
   0xe   : > { %p2846_p8 = por %p237_p5, %p236_p3  ;;  %p378_p9 = scmp.lt.s32.totalorder %s2737_s18, 3 }
   0xf   : > { %s2852_s26 = scalar_select %p218_p7, %s2725_s15, %s220_s22  }
  0x10   : > { %p379_p10 = pnand %p2496_p6, %p378_p9 }
  0x11   : > { %p450_p11 = scmp.lt.s32.totalorder (!%p379_p10), %s2729_s16, 1  ;;  %s3015_s0 = sld [smem:[#allocation7_spill]] (!%p379_p10) }
  0x12   : > { %382 = sbr.rel (%p379_p10) target bundleno = 530 (0x212), region = 48  ;;  %s3016_s1 = sld [smem:[#allocation8_spill]] (!%p379_p10) }
  0x13   : > { %s2505_s28 = sshll.u32 (!%p379_p10), %s2729_s16, 7 }
  0x14   : > { %s2293_s20 = scalar_lea.hbm (!%p379_p10), %s3007_s7, %s2505_s28 }
  0x17   : > { %v616_v0 = vlaneseq  ;;  %v2739_v1 = vmov 0   ;;  %s2856_s27 = scalar_select %p450_p11, %s2729_s16, 1  ;;  %v2740_v2 = vmov 1966171168   ;;  %vm933_vm0 = vcmask 1040384   ;;  %v2248_v27 = vld [vmem:[%s3006_s6] sm:$0xff] }
  0x18   : > { %2651 = vset.pattern.permute.xlu0 %v2739_v1  ;;  %2652 = vset.pattern.permute.xlu1 %v2739_v1  ;;  %v614_v3 = vunpack.c.l.s4 %v2740_v2  ;;  %v2503_v5 = vld.sshfl [vmem:[%s3015_s0] sm:$0x13 pattern:$0x75316420]  ;;  %vm935_vm1 = vcmask 1041408   ;;  %v2741_v26 = vmov 0.0  }
  0x19   : > { %v617_v4 = vshrl.u32 %v616_v0, 7  ;;  %s455_s12 = scalar_lea.vmem %s3016_s1, %s2856_s27  ;;  %s467_s22 = scalar_lea.vmem %s3003_s3, %s2856_s27  ;;  %v612_v8 = vcombine.high %v2503_v5, %v2503_v5  ;;  %493 = vst [vmem:[#allocation2] sm:$0x7] %v2741_v26  ;;  %494 = vst [vmem:[#allocation3] sm:$0x7] %v2741_v26  ;;  %2532 = vmatprep.subr.mxu0 %v2741_v26  ;;  %2537 = vmatprep.subr.mxu1 %v2741_v26  ;;  %vm2742_vm2 = vmmov 0  }
  0x1a   : > { %v615_v6 = vunpack.c.0.s8 %v614_v3  ;;  %v2501_v9 = vld [vmem:[%s455_s12] ss:$0 sm:$0xff]  ;;  %s461_s11 = scalar_lea.vmem %s3002_s2, %s2856_s27  ;;  %2534 = vmatprep.mubr.msk.f32.mxu0 %vm2742_vm2, %v2741_v26  ;;  %2539 = vmatprep.mubr.msk.f32.mxu1 %vm2742_vm2, %v2741_v26  ;;  %vm1004_vm3 = vcmask 1041409   ;;  %vm1006_vm4 = vcmask 1042434   ;;  %s2889_s12 = sshll.u32 %s2856_s27, 2  ;;  %vm1342_vm5 = vcmask 23552  }
  0x1b   : > { %v630_v7 = vsub.s32 0, %v617_v4  ;;  %v498_v10 = vld [vmem:[%s467_s22] sm:$0x1]  ;;  %504 = vbcast.lane.b32.xlu1 %v2501_v9, 256  ;;  %v1081_v14 = vsub.s32 1, %v617_v4  ;;  %v1148_v24 = vsub.s32 2, %v617_v4  ;;  %s488_s22 = scalar_lea.vmem %s3010_s10, %s2889_s12  ;;  %s481_s19 = scalar_lea.vmem %s3009_s9, %s2889_s12 }
  0x1c   : > { %v618_v11 = vsub.s32 %v615_v6, %v617_v4  ;;  %v2502_v28 = vld [vmem:[%s461_s11] ss:$0 sm:$0xff]  ;;  %s474_s27 = scalar_lea.vmem %s3008_s8, %s2889_s12  ;;  %vm1346_vm6 = vcmask 1042432   ;;  %s420_s12 = sand.u32 1, %s2721_s14  }
  0x1d   : > { %v931_v12 = vrot.slane %v498_v10, %v630_v7  ;;  %s2497_s24 = sshll.u32 %s420_s12, 3  ;;  %s2743_s0 = smov [#allocation4]  }
  0x1e   : > { %v619_v13 = vrot.slane %v2503_v5, %v618_v11  ;;  %v626_v16 = vrot.slane %v612_v8, %v618_v11  ;;  %s422_s29 = scalar_lea.vmem [#allocation4], %s2497_s24  ;;  %s2665_s16 = sshll.u32 %s2743_s0, 4  ;;  %s2666_s16 = int_to_ptr.vmem [resolvable:$false] %s2665_s16 }
  0x1f   : > { %v934_v15 = vsel %vm933_vm0, %v498_v10, %v931_v12  ;;  %s2295_s30 = sshll.u32 %s422_s29, 4  ;;  %s2667_s24 = scalar_lea.vmem %s2666_s16, 256  ;;  %s2296_s30 = int_to_ptr.vmem [resolvable:$true] %s2295_s30 }
  0x20   : > { %v936_v17 = vsel %vm935_vm1, %v934_v15, %v931_v12  ;;  %v631_v18 = vrot.slane %v619_v13, %v630_v7  ;;  %v627_v20 = vcombine.high %v619_v13, %v619_v13  ;;  %v635_v22 = vrot.slane %v626_v16, %v630_v7  ;;  %p2668_p1 = scmp.lt.s32.totalorder %s2296_s30, %s2666_s16 }
  0x21   : > { %v1015_v19 = vrot.slane %v936_v17, %v630_v7  ;;  %v1082_v21 = vrot.slane %v936_v17, %v1081_v14  ;;  %v1149_v25 = vrot.slane %v936_v17, %v1148_v24 }
  0x22   : > { %641 = vperm.xlu0 %2651, %v631_v18   ;;  %v639_v23 = vrot.slane %v627_v20, %v630_v7  ;;  %v937_v20 = vld [vmem:[#allocation2] sm:$0x7] }
  0x23   : > { %1021 = vbcast.lane.b32.xlu1 %v1015_v19, 264 }
  0x26   : > { %645 = vperm.xlu0 %2651, %v635_v22  }
  0x27   : > { %1088 = vbcast.lane.b32.xlu1 %v1082_v21, 264 }
  0x2a   : > { %1017 = vbcast.lane.b32.xlu0 %v1015_v19, 256 }
  0x2b   : > { %649 = vperm.xlu1 %2652, %v639_v23  }
  0x2e   : > { %1084 = vbcast.lane.b32.xlu0 %v1082_v21, 256 }
  0x2f   : > { %1155 = vbcast.lane.b32.xlu1 %v1149_v25, 264 }
  0x32   : > { %1151 = vbcast.lane.b32.xlu0 %v1149_v25, 256 }
  0x33   : > { %1092 = vbcast.lane.b32.xlu1 %v1082_v21, 272 }
  0x36   : > { %1025 = vbcast.lane.b32.xlu0 %v1015_v19, 272 }
  0x37   : > { %1029 = vbcast.lane.b32.xlu1 %v1015_v19, 280 }
  0x3a   : > { %1159 = vbcast.lane.b32.xlu0 %v1149_v25, 272 }
  0x3b   : > { %1163 = vbcast.lane.b32.xlu1 %v1149_v25, 280 }
  0x3e   : > { %1096 = vbcast.lane.b32.xlu0 %v1082_v21, 280 }
  0x3f   : > { %1100 = vbcast.lane.b32.xlu1 %v1082_v21, 288 }
  0x42   : > { %1033 = vbcast.lane.b32.xlu0 %v1015_v19, 288 }
  0x43   : > { %1037 = vbcast.lane.b32.xlu1 %v1015_v19, 296 }
  0x46   : > { %1167 = vbcast.lane.b32.xlu0 %v1149_v25, 288 }
  0x47   : > { %1171 = vbcast.lane.b32.xlu1 %v1149_v25, 296 }
  0x4a   : > { %1104 = vbcast.lane.b32.xlu0 %v1082_v21, 296 }
  0x4b   : > { %1108 = vbcast.lane.b32.xlu1 %v1082_v21, 304 }
  0x4e   : > { %1041 = vbcast.lane.b32.xlu0 %v1015_v19, 304 }
  0x4f   : > { %1045 = vbcast.lane.b32.xlu1 %v1015_v19, 312 }
  0x52   : > { %1175 = vbcast.lane.b32.xlu0 %v1149_v25, 304 }
  0x53   : > { %1179 = vbcast.lane.b32.xlu1 %v1149_v25, 312 }
  0x56   : > { %1112 = vbcast.lane.b32.xlu0 %v1082_v21, 312 }
  0x57   : > { %1116 = vbcast.lane.b32.xlu1 %v1082_v21, 320 }
  0x5a   : > { %1049 = vbcast.lane.b32.xlu0 %v1015_v19, 320 }
  0x5b   : > { %1053 = vbcast.lane.b32.xlu1 %v1015_v19, 328 }
  0x5e   : > { %1183 = vbcast.lane.b32.xlu0 %v1149_v25, 320 }
  0x5f   : > { %1187 = vbcast.lane.b32.xlu1 %v1149_v25, 328 }
  0x62   : > { %1120 = vbcast.lane.b32.xlu0 %v1082_v21, 328 }
  0x63   : > { %1124 = vbcast.lane.b32.xlu1 %v1082_v21, 336 }
  0x66   : > { %1057 = vbcast.lane.b32.xlu0 %v1015_v19, 336 }
  0x67   : > { %1061 = vbcast.lane.b32.xlu1 %v1015_v19, 344 }
  0x6a   : > { %1191 = vbcast.lane.b32.xlu0 %v1149_v25, 336 }
  0x6b   : > { %1195 = vbcast.lane.b32.xlu1 %v1149_v25, 344 }
  0x6e   : > { %1128 = vbcast.lane.b32.xlu0 %v1082_v21, 344 }
  0x6f   : > { %1132 = vbcast.lane.b32.xlu1 %v1082_v21, 352 }
  0x72   : > { %1065 = vbcast.lane.b32.xlu0 %v1015_v19, 352 }
  0x73   : > { %1069 = vbcast.lane.b32.xlu1 %v1015_v19, 360 }
  0x76   : > { %1199 = vbcast.lane.b32.xlu0 %v1149_v25, 352 }
  0x77   : > { %1203 = vbcast.lane.b32.xlu1 %v1149_v25, 360 }
  0x7a   : > { %1136 = vbcast.lane.b32.xlu0 %v1082_v21, 360 }
  0x7b   : > { %1140 = vbcast.lane.b32.xlu1 %v1082_v21, 368 }
  0x7e   : > { %1073 = vbcast.lane.b32.xlu0 %v1015_v19, 368 }
  0x7f   : > { %1077 = vbcast.lane.b32.xlu1 %v1015_v19, 376 }
  0x82   : > { %1207 = vbcast.lane.b32.xlu0 %v1149_v25, 368 }
  0x83   : > { %1211 = vbcast.lane.b32.xlu1 %v1149_v25, 376 }
  0x86   : > { %1144 = vbcast.lane.b32.xlu0 %v1082_v21, 376 }
  0x8a   : > { %2251 = vperm.xlu0 %2651, %v2248_v27  }
  0x8d   : > { %v505_v29 = vpop.permute.xlu1 %504 }
  0x8e   : > { %v572_v30 = vsub.f32 %v505_v29, %v2502_v28 }
  0x90   : > { %v588_v32 = vmul.f32 %v572_v30, %v572_v30 }
  0x95   : > { %v1022_v31 = vpop.permute.xlu1 %1021 }
  0x96   : > { %v1214_v49 = vmul.f32 0.0, %v1022_v31 }
  0x99   : > { %v1089_v36 = vpop.permute.xlu1 %1088 }
  0x9a   : > { %v1230_v57 = vmul.f32 0.0, %v1089_v36 }
  0x9d   : > { %v642_v33 = vpop.permute.xlu0 %641 }
  0x9e   : > { %v652_v34 = vmul.f32 %v642_v33, %v588_v32 }
  0xa0   : > { %v700_v35 = vmul.f32 1.442695, %v652_v34 }
  0xa1   : > { %v646_v37 = vpop.permute.xlu0 %645 }
  0xa2   : > { %2653 = vpow2.f32 %v700_v35  ;;  %v668_v38 = vmul.f32 %v646_v37, %v588_v32 }
  0xa4   : > { %v732_v39 = vmul.f32 1.442695, %v668_v38 }
  0xa5   : > { %v1018_v40 = vpop.permute.xlu0 %1017 }
  0xa6   : > { %v650_v41 = vpop.permute.xlu1 %649  ;;  %2655 = vpow2.f32 %v732_v39 }
  0xa7   : > { %v684_v42 = vmul.f32 %v650_v41, %v588_v32 }
  0xa9   : > { %v764_v43 = vmul.f32 1.442695, %v684_v42  ;;  %v1085_v44 = vpop.permute.xlu0 %1084 }
  0xaa   : > { %v1156_v45 = vpop.permute.xlu1 %1155 }
  0xab   : > { %2657 = vpow2.f32 %v764_v43  ;;  %v1246_v37 = vmul.f32 0.0, %v1156_v45 }
  0xad   : > { %v1152_v46 = vpop.permute.xlu0 %1151 }
  0xae   : > { %v2884_v47 = vpop.permute.xlu1 %1092 }
  0xaf   : > { %v2654_v48 = vpop.eup %2653 }
  0xb0   : > { %v1213_v50 = vmul.f32 %v2654_v48, %v1018_v40  ;;  %v953_v51 = vrot.slane %v2654_v48, 4 }
  0xb1   : > { %v1026_v52 = vpop.permute.xlu0 %1025 }
  0xb2   : > { %v1030_v53 = vpop.permute.xlu1 %1029  ;;  %v1261_v54 = vadd.f32 %v1214_v49, %v1213_v50  ;;  %v954_v55 = vadd.f32 %v2654_v48, %v953_v51  ;;  %v1215_v36 = vmul.f32 0.0, %v1026_v52  ;;  %v1231_v51 = vmul.f32 0.0, %v2884_v47 }
  0xb3   : > { %v2656_v56 = vpop.eup %2655  ;;  %v1216_v42 = vmul.f32 0.0, %v1030_v53 }
  0xb4   : > { %v1229_v58 = vmul.f32 %v2656_v56, %v1085_v44  ;;  %v974_v59 = vrot.slane %v2656_v56, 4  ;;  %v955_v63 = vrot.slane %v954_v55, 2  ;;  %v1262_v41 = vadd.f32 %v1261_v54, %v1215_v36 }
  0xb5   : > { %v1160_v60 = vpop.permute.xlu0 %1159 }
  0xb6   : > { %v1164_v61 = vpop.permute.xlu1 %1163  ;;  %v1282_v62 = vadd.f32 %v1230_v57, %v1229_v58  ;;  %v975_v1 = vadd.f32 %v2656_v56, %v974_v59  ;;  %v956_v6 = vadd.f32 %v955_v63, %v954_v55  ;;  %v1247_v43 = vmul.f32 0.0, %v1160_v60 }
  0xb7   : > { %v1263_v55 = vadd.f32 %v1262_v41, %v1216_v42  ;;  %v1248_v57 = vmul.f32 0.0, %v1164_v61 }
  0xb8   : > { %v2658_v0 = vpop.eup %2657  ;;  %v976_v5 = vrot.slane %v975_v1, 2  ;;  %v957_v13 = vrot.slane %v956_v6, 1  ;;  %v1283_v52 = vadd.f32 %v1282_v62, %v1231_v51 }
  0xb9   : > { %v995_v2 = vrot.slane %v2658_v0, 4  ;;  %v1097_v3 = vpop.permute.xlu0 %1096  ;;  %v1245_v35 = vmul.f32 %v2658_v0, %v1152_v46 }
  0xba   : > { %v1101_v4 = vpop.permute.xlu1 %1100  ;;  %v977_v8 = vadd.f32 %v976_v5, %v975_v1  ;;  %v958_v19 = vadd.f32 %v957_v13, %v956_v6  ;;  %v1232_v56 = vmul.f32 0.0, %v1097_v3 }
  0xbb   : > { %v996_v7 = vadd.f32 %v2658_v0, %v995_v2  ;;  %v1303_v40 = vadd.f32 %v1246_v37, %v1245_v35  ;;  %v1233_v54 = vmul.f32 0.0, %v1101_v4 }
  0xbc   : > { %v978_v12 = vrot.slane %v977_v8, 1  ;;  %v1284_v1 = vadd.f32 %v1283_v52, %v1232_v56 }
  0xbd   : > { %v997_v9 = vrot.slane %v996_v7, 2  ;;  %v1034_v10 = vpop.permute.xlu0 %1033  ;;  %v1304_v50 = vadd.f32 %v1303_v40, %v1247_v43 }
  0xbe   : > { %v1038_v11 = vpop.permute.xlu1 %1037  ;;  %v979_v15 = vadd.f32 %v978_v12, %v977_v8  ;;  %v1217_v49 = vmul.f32 0.0, %v1034_v10 }
  0xbf   : > { %v998_v14 = vadd.f32 %v997_v9, %v996_v7  ;;  %v1218_v63 = vmul.f32 0.0, %v1038_v11  ;;  %v1305_v0 = vadd.f32 %v1304_v50, %v1248_v57  ;;  %v1285_v9 = vadd.f32 %v1284_v1, %v1233_v54 }
  0xc0   : > { %v1005_v22 = vsel %vm1004_vm3, %v979_v15, %v958_v19  ;;  %v1264_v45 = vadd.f32 %v1263_v55, %v1217_v49 }
  0xc1   : > { %v1168_v16 = vpop.permute.xlu0 %1167  ;;  %v999_v18 = vrot.slane %v998_v14, 1 }
  0xc2   : > { %v1172_v17 = vpop.permute.xlu1 %1171  ;;  %v1249_v58 = vmul.f32 0.0, %v1168_v16  ;;  %v1265_v7 = vadd.f32 %v1264_v45, %v1218_v63 }
  0xc3   : > { %v1000_v21 = vadd.f32 %v999_v18, %v998_v14  ;;  %v1250_v2 = vmul.f32 0.0, %v1172_v17 }
  0xc4   : > { %v1306_v60 = vadd.f32 %v1305_v0, %v1249_v58 }
  0xc5   : > { %v1105_v23 = vpop.permute.xlu0 %1104  ;;  %v1007_v25 = vsel %vm1006_vm4, %v1000_v21, %v1005_v22 }
  0xc6   : > { %v1109_v24 = vpop.permute.xlu1 %1108  ;;  %v1009_v27 = vadd.f32 %v1007_v25, %v937_v20  ;;  %v1234_v8 = vmul.f32 0.0, %v1105_v23  ;;  %v1307_v10 = vadd.f32 %v1306_v60, %v1250_v2 }
  0xc7   : > { %v1235_v14 = vmul.f32 0.0, %v1109_v24 }
  0xc8   : > { %1010 = vst [vmem:[#allocation2] sm:$0x7] %v1009_v27  ;;  %v1286_v62 = vadd.f32 %v1285_v9, %v1234_v8 }
  0xc9   : > { %v1042_v28 = vpop.permute.xlu0 %1041 }
  0xca   : > { %v1046_v29 = vpop.permute.xlu1 %1045  ;;  %v1219_v53 = vmul.f32 0.0, %v1042_v28  ;;  %v1287_v21 = vadd.f32 %v1286_v62, %v1235_v14 }
  0xcb   : > { %v1220_v61 = vmul.f32 0.0, %v1046_v29 }
  0xcc   : > { %v1266_v3 = vadd.f32 %v1265_v7, %v1219_v53 }
  0xcd   : > { %v1176_v30 = vpop.permute.xlu0 %1175 }
  0xce   : > { %v1180_v31 = vpop.permute.xlu1 %1179  ;;  %v1251_v47 = vmul.f32 0.0, %v1176_v30  ;;  %v1267_v4 = vadd.f32 %v1266_v3, %v1220_v61 }
  0xcf   : > { %v2895_v32 = vld [vmem:[#allocation2] sm:$0x7]  ;;  %v1252_v16 = vmul.f32 0.0, %v1180_v31 }
  0xd0   : > { %2258 = vst [vmem:[%s488_s22] sm:$0x7] %v2895_v32  ;;  %v1308_v15 = vadd.f32 %v1307_v10, %v1251_v47  ;;  %s2260_s22 = scalar_lea.sflag [#allocation5], %s420_s12 }
  0xd1   : > { %v1113_v33 = vpop.permute.xlu0 %1112 }
  0xd2   : > { %v1117_v34 = vpop.permute.xlu1 %1116  ;;  %v1236_v18 = vmul.f32 0.0, %v1113_v33  ;;  %v1309_v25 = vadd.f32 %v1308_v15, %v1252_v16 }
  0xd3   : > { %v1237_v28 = vmul.f32 0.0, %v1117_v34 }
  0xd4   : > { %v1288_v27 = vadd.f32 %v1287_v21, %v1236_v18 }
  0xd5   : > { %v1050_v38 = vpop.permute.xlu0 %1049 }
  0xd6   : > { %v1054_v39 = vpop.permute.xlu1 %1053  ;;  %v1221_v11 = vmul.f32 0.0, %v1050_v38  ;;  %v1289_v31 = vadd.f32 %v1288_v27, %v1237_v28 }
  0xd7   : > { %v1222_v23 = vmul.f32 0.0, %v1054_v39 }
  0xd8   : > { %v1268_v22 = vadd.f32 %v1267_v4, %v1221_v11 }
  0xd9   : > { %v1184_v44 = vpop.permute.xlu0 %1183 }
  0xda   : > { %v1188_v48 = vpop.permute.xlu1 %1187  ;;  %v1253_v19 = vmul.f32 0.0, %v1184_v44  ;;  %v1269_v24 = vadd.f32 %v1268_v22, %v1222_v23 }
  0xdb   : > { %v1254_v35 = vmul.f32 0.0, %v1188_v48 }
  0xdc   : > { %v1310_v30 = vadd.f32 %v1309_v25, %v1253_v19 }
  0xdd   : > { %v1121_v59 = vpop.permute.xlu0 %1120 }
  0xde   : > { %v1125_v46 = vpop.permute.xlu1 %1124  ;;  %v1238_v38 = vmul.f32 0.0, %v1121_v59  ;;  %v1311_v42 = vadd.f32 %v1310_v30, %v1254_v35 }
  0xdf   : > { %v1239_v50 = vmul.f32 0.0, %v1125_v46 }
  0xe0   : > { %v1290_v49 = vadd.f32 %v1289_v31, %v1238_v38  ;;  %v1337_v38 = vadd.f32 1e-06, %v2895_v32 }
  0xe1   : > { %v1058_v5 = vpop.permute.xlu0 %1057 }
  0xe2   : > { %v1062_v6 = vpop.permute.xlu1 %1061  ;;  %v1223_v29 = vmul.f32 0.0, %v1058_v5  ;;  %v1291_v52 = vadd.f32 %v1290_v49, %v1239_v50  ;;  %2659 = vrcp.f32 %v1337_v38  ;;  %v1011_v49 = vld [vmem:[#allocation3] sm:$0x7] }
  0xe3   : > { %v1224_v33 = vmul.f32 0.0, %v1062_v6 }
  0xe4   : > { %v1270_v41 = vadd.f32 %v1269_v24, %v1223_v29 }
  0xe5   : > { %v1192_v12 = vpop.permute.xlu0 %1191 }
  0xe6   : > { %v1196_v13 = vpop.permute.xlu1 %1195  ;;  %v1255_v40 = vmul.f32 0.0, %v1192_v12  ;;  %v1271_v34 = vadd.f32 %v1270_v41, %v1224_v33 }
  0xe7   : > { %v1256_v55 = vmul.f32 0.0, %v1196_v13 }
  0xe8   : > { %v1312_v51 = vadd.f32 %v1311_v42, %v1255_v40 }
  0xe9   : > { %v1129_v17 = vpop.permute.xlu0 %1128 }
  0xea   : > { %v1133_v20 = vpop.permute.xlu1 %1132  ;;  %v1240_v56 = vmul.f32 0.0, %v1129_v17  ;;  %v1313_v63 = vadd.f32 %v1312_v51, %v1256_v55 }
  0xeb   : > { %v1241_v1 = vmul.f32 0.0, %v1133_v20 }
  0xec   : > { %v1292_v0 = vadd.f32 %v1291_v52, %v1240_v56 }
  0xed   : > { %v1066_v36 = vpop.permute.xlu0 %1065 }
  0xee   : > { %v1070_v37 = vpop.permute.xlu1 %1069  ;;  %v1225_v39 = vmul.f32 0.0, %v1066_v36  ;;  %v1293_v8 = vadd.f32 %v1292_v0, %v1241_v1  ;;  %v1341_v36 = vld [vmem:[%s3005_s5] sm:$0xff]  ;;  %v1800_v1 = vsel %vm1346_vm6, %v2895_v32, 0 }
  0xef   : > { %v1226_v59 = vmul.f32 0.0, %v1070_v37  ;;  %v1344_v31 = vsel %vm1342_vm5, %v1341_v36, 0 }
  0xf0   : > { %v1272_v45 = vadd.f32 %v1271_v34, %v1225_v39  ;;  %v1340_v34 = vld [vmem:[%s3004_s4] sm:$0xff] }
  0xf1   : > { %v1200_v43 = vpop.permute.xlu0 %1199 }
  0xf2   : > { %v1204_v44 = vpop.permute.xlu1 %1203  ;;  %v1257_v57 = vmul.f32 0.0, %v1200_v43  ;;  %v1273_v5 = vadd.f32 %v1272_v45, %v1226_v59  ;;  %v2904_v43 = vand.u32 4294901760, %v1344_v31 }
  0xf3   : > { %v1258_v53 = vmul.f32 0.0, %v1204_v44 }
  0xf4   : > { %v1314_v54 = vadd.f32 %v1313_v63, %v1257_v57  ;;  %v1417_v55 = vsub.f32 %v1344_v31, %v2904_v43  ;;  %v1797_v57 = vsel %vm1342_vm5, %v1340_v34, 0 }
  0xf5   : > { %v1137_v48 = vpop.permute.xlu0 %1136  ;;  %v2921_v45 = vand.u32 4294901760, %v1797_v57 }
  0xf6   : > { %v1141_v58 = vpop.permute.xlu1 %1140  ;;  %v1242_v46 = vmul.f32 0.0, %v1137_v48  ;;  %v1315_v9 = vadd.f32 %v1314_v54, %v1258_v53  ;;  %v1418_v56 = vand.u32 4294901760, %v1417_v55 }
  0xf7   : > { %v1243_v3 = vmul.f32 0.0, %v1141_v58  ;;  %v2660_v58 = vpop.eup %2659  ;;  %v1869_v53 = vsub.f32 %v1797_v57, %v2921_v45 }
  0xf8   : > { %v1294_v12 = vadd.f32 %v1293_v8, %v1242_v46  ;;  %v1419_v48 = vsub.f32 %v1417_v55, %v1418_v56 }
  0xf9   : > { %v1074_v60 = vpop.permute.xlu0 %1073  ;;  %v1870_v46 = vand.u32 4294901760, %v1869_v53 }
  0xfa   : > { %v1078_v2 = vpop.permute.xlu1 %1077  ;;  %v1227_v6 = vmul.f32 0.0, %v1074_v60  ;;  %v1295_v4 = vadd.f32 %v1294_v12, %v1243_v3  ;;  %v1420_v0 = vand.u32 4294901760, %v1419_v48 }
  0xfb   : > { %v1228_v7 = vmul.f32 0.0, %v1078_v2  ;;  %v1833_v2 = vand.u32 4294901760, %v1800_v1  ;;  %v1871_v8 = vsub.f32 %v1869_v53, %v1870_v46 }
  0xfc   : > { %v1274_v47 = vadd.f32 %v1273_v5, %v1227_v6 }
  0xfd   : > { %v1208_v61 = vpop.permute.xlu0 %1207 }
  0xfe   : > { %v1212_v10 = vpop.permute.xlu1 %1211  ;;  %v1275_v13 = vadd.f32 %v1274_v47, %v1228_v7  ;;  %v1259_v62 = vmul.f32 0.0, %v1208_v61  ;;  %v1910_v7 = vsub.f32 %v1800_v1, %v1833_v2 }
  0xff   : > { %v1260_v14 = vmul.f32 0.0, %v1212_v10 }
 0x100   : > { %v1276_v11 = vrot.slane %v1275_v13, 4  ;;  %v1316_v15 = vadd.f32 %v1315_v9, %v1259_v62  ;;  %v1911_v47 = vand.u32 4294901760, %v1910_v7  ;;  %v1872_v9 = vand.u32 4294901760, %v1871_v8 }
 0x101   : > { %v1145_v16 = vpop.permute.xlu0 %1144 }
 0x102   : > { %v1277_v18 = vadd.f32 %v1276_v11, %v1275_v13  ;;  %v1317_v19 = vadd.f32 %v1316_v15, %v1260_v14  ;;  %v1244_v17 = vmul.f32 0.0, %v1145_v16  ;;  %v1912_v3 = vsub.f32 %v1910_v7, %v1911_v47 }
 0x104   : > { %v1278_v20 = vrot.slane %v1277_v18, 2  ;;  %v1318_v21 = vrot.slane %v1317_v19, 4  ;;  %v1296_v22 = vadd.f32 %v1295_v4, %v1244_v17  ;;  %v1913_v61 = vand.u32 4294901760, %v1912_v3 }
 0x106   : > { %v1319_v23 = vadd.f32 %v1318_v21, %v1317_v19  ;;  %v1297_v25 = vrot.slane %v1296_v22, 4  ;;  %v1279_v27 = vadd.f32 %v1278_v20, %v1277_v18 }
 0x108   : > { %v1320_v28 = vrot.slane %v1319_v23, 2  ;;  %v1298_v29 = vadd.f32 %v1297_v25, %v1296_v22  ;;  %v1280_v37 = vrot.slane %v1279_v27, 1 }
 0x10a   : > { %v1321_v30 = vadd.f32 %v1320_v28, %v1319_v23  ;;  %v1299_v35 = vrot.slane %v1298_v29, 2  ;;  %v1281_v33 = vadd.f32 %v1280_v37, %v1279_v27 }
 0x10c   : > { %v1300_v24 = vadd.f32 %v1299_v35, %v1298_v29  ;;  %v1322_v40 = vrot.slane %v1321_v30, 1 }
 0x10e   : > { %v1301_v41 = vrot.slane %v1300_v24, 1  ;;  %v1323_v44 = vadd.f32 %v1322_v40, %v1321_v30 }
 0x110   : > { %v1302_v42 = vadd.f32 %v1301_v41, %v1300_v24 }
 0x112   : > { %v1327_v50 = vsel %vm1004_vm3, %v1302_v42, %v1281_v33 }
 0x113   : > { %v1328_v39 = vsel %vm1006_vm4, %v1323_v44, %v1327_v50 }
 0x114   : > { %v1330_v51 = vadd.f32 %v1328_v39, %v1011_v49  ;;  %v2252_v49 = vpop.permute.xlu0 %2251 }
 0x116   : > { %1331 = vst [vmem:[#allocation3] sm:$0x7] %v1330_v51 }
 0x11d   : > { %v1336_v52 = vld [vmem:[#allocation3] sm:$0x7] }
 0x11e   : > { %v1339_v59 = vmul.f32 %v2660_v58, %v1336_v52  ;;  %2257 = vst [vmem:[%s481_s19] sm:$0x7] %v1336_v52 }
 0x120   : > { %v1348_v63 = vsel %vm1346_vm6, %v1339_v59, 0  ;;  %2256 = vst [vmem:[%s474_s27] sm:$0x7] %v1339_v59  ;;  %s2661_s27 = scalar_lea.vmem %s2296_s30, 128 }
 0x121   : > { %v1381_v54 = vand.u32 4294901760, %v1348_v63  ;;  %p2662_p12 = scmp.ne.s32.totalorder %s2296_s30, %s2661_s27  ;;  %p2669_p2 = scmp.lt.s32.totalorder %s2667_s24, %s2661_s27 }
 0x123   : > { %2533 = vmatpush3.msra.mxu0 %v1381_v54  ;;  %v1458_v60 = vsub.f32 %v1348_v63, %v1381_v54  ;;  %p2663_p13 = pnand %p2662_p12, %p2839_p4  ;;  %p2670_p3 = por %p2669_p2, %p2668_p1 }
 0x124   : > { %2535 = vmatmul.mubr.f32.vlgmr.msra.gmra.mxu0 %v1420_v0  ;;  %2542 = vmatprep.subr.mxu0 %v2741_v26 }
 0x125   : > { %2543 = vmatpush3.msra.mxu0 %v1458_v60  ;;  %2544 = vmatprep.mubr.msk.f32.mxu0 %vm2742_vm2, %v2741_v26  ;;  %v1459_v5 = vand.u32 4294901760, %v1458_v60  ;;  %p2664_p0 = pneg %p2663_p13 }
 0x126   : > { %2552 = vmatprep.subr.mxu0 %v2741_v26 }
 0x127   : > { %v1460_v6 = vsub.f32 %v1458_v60, %v1459_v5  ;;  %p2671_p5 = pnand %p2670_p3, %p2664_p0 }
 0x128   : > { %2545 = vmatmul.mubr.f32.vlgmr.msra.gmra.mxu0 %v1417_v55 }
 0x129   : > { %2553 = vmatpush3.msra.mxu0 %v1459_v5  ;;  %v1461_v32 = vand.u32 4294901760, %v1460_v6  ;;  %2554 = vmatprep.mubr.msk.f32.mxu0 %vm2742_vm2, %v2741_v26 }
 0x12a   : > { %2562 = vmatprep.subr.mxu0 %v2741_v26 }
 0x12b   : > { %2538 = vmatpush3.msra.mxu1 %v1461_v32 }
 0x12c   : > { %2540 = vmatmul.mubr.f32.vlgmr.msra.gmra.mxu1 %v2904_v43  ;;  %2547 = vmatprep.subr.mxu1 %v2741_v26 }
 0x12d   : > { %2555 = vmatmul.mubr.f32.vlgmr.msra.gmra.mxu0 %v2904_v43  ;;  %2548 = vmatpush3.msra.mxu1 %v1381_v54 }
 0x12e   : > { %2563 = vmatpush3.msra.mxu0 %v1833_v2  ;;  %2549 = vmatprep.mubr.msk.f32.mxu1 %vm2742_vm2, %v2741_v26 }
 0x12f   : > { %2557 = vmatprep.subr.mxu1 %v2741_v26  ;;  %2564 = vmatprep.mubr.msk.f32.mxu0 %vm2742_vm2, %v2741_v26 }
 0x130   : > { %2572 = vmatprep.subr.mxu0 %v2741_v26  ;;  %2550 = vmatmul.mubr.f32.vlgmr.msra.gmra.mxu1 %v1418_v56 }
 0x131   : > { %2558 = vmatpush3.msra.mxu1 %v1381_v54  ;;  %2565 = vmatmul.mubr.f32.vlgmr.msra.gmra.mxu0 %v1872_v9 }
 0x132   : > { %2573 = vmatpush3.msra.mxu0 %v1910_v7  ;;  %2559 = vmatprep.mubr.msk.f32.mxu1 %vm2742_vm2, %v2741_v26 }
 0x133   : > { %2567 = vmatprep.subr.mxu1 %v2741_v26  ;;  %2574 = vmatprep.mubr.msk.f32.mxu0 %vm2742_vm2, %v2741_v26 }
 0x134   : > { %2582 = vmatprep.subr.mxu0 %v2741_v26  ;;  %2560 = vmatmul.mubr.f32.vlgmr.msra.gmra.mxu1 %v2904_v43 }
 0x135   : > { %2568 = vmatpush3.msra.mxu1 %v1913_v61  ;;  %2575 = vmatmul.mubr.f32.vlgmr.msra.gmra.mxu0 %v1869_v53 }
 0x136   : > { %2583 = vmatpush3.msra.mxu0 %v1911_v47  ;;  %2569 = vmatprep.mubr.msk.f32.mxu1 %vm2742_vm2, %v2741_v26 }
 0x137   : > { %2577 = vmatprep.subr.mxu1 %v2741_v26  ;;  %2584 = vmatprep.mubr.msk.f32.mxu0 %vm2742_vm2, %v2741_v26 }
 0x138   : > { %2570 = vmatmul.mubr.f32.vlgmr.msra.gmra.mxu1 %v2921_v45 }
 0x139   : > { %2578 = vmatpush3.msra.mxu1 %v1833_v2  ;;  %2579 = vmatprep.mubr.msk.f32.mxu1 %vm2742_vm2, %v2741_v26 }
 0x13a   : > { %2587 = vmatprep.subr.mxu1 %v2741_v26  ;;  %2585 = vmatmul.mubr.f32.vlgmr.msra.gmra.mxu0 %v2921_v45 }
 0x13c   : > { %2580 = vmatmul.mubr.f32.vlgmr.msra.gmra.mxu1 %v1870_v46 }
 0x13d   : > { %2588 = vmatpush3.msra.mxu1 %v1833_v2  ;;  %2589 = vmatprep.mubr.msk.f32.mxu1 %vm2742_vm2, %v2741_v26 }
 0x140   : > { %2590 = vmatmul.mubr.f32.vlgmr.msra.gmra.mxu1 %v2921_v45 }
 0x1e4   : > { %v1422_v10 = vpop.f32.mrf.mxu0 }
 0x1e6   : > { %v2536_v12 = vpop.f32.mrf.mxu0 }
 0x1e8   : > { %v1572_v13 = vpop.f32.mrf.mxu0 }
 0x1ea   : > { %v2546_v62 = vpop.f32.mrf.mxu0 }
 0x1ec   : > { %v1498_v14 = vpop.f32.mrf.mxu1 }
 0x1ed   : > { %v1499_v11 = vadd.f32 %v1498_v14, %v1422_v10  ;;  %v1720_v15 = vpop.f32.mrf.mxu0 }
 0x1ee   : > { %v2541_v16 = vpop.f32.mrf.mxu1 }
 0x1ef   : > { %v1573_v4 = vadd.f32 %v1572_v13, %v1499_v11  ;;  %v2556_v18 = vpop.f32.mrf.mxu0 }
 0x1f0   : > { %v1646_v19 = vpop.f32.mrf.mxu1 }
 0x1f1   : > { %v1647_v17 = vadd.f32 %v1646_v19, %v1573_v4  ;;  %v1874_v20 = vpop.f32.mrf.mxu0 }
 0x1f2   : > { %v2551_v21 = vpop.f32.mrf.mxu1 }
 0x1f3   : > { %v1721_v22 = vadd.f32 %v1720_v15, %v1647_v17  ;;  %v2566_v23 = vpop.f32.mrf.mxu0 }
 0x1f4   : > { %v1792_v26 = vpop.f32.mrf.mxu1 }
 0x1f5   : > { %v1793_v25 = vadd.f32 %v1792_v26, %v1721_v22  ;;  %v2024_v27 = vpop.f32.mrf.mxu0 }
 0x1f6   : > { %v2561_v28 = vpop.f32.mrf.mxu1 }
 0x1f7   : > { %v1875_v29 = vadd.f32 %v1874_v20, %v1793_v25  ;;  %v2576_v30 = vpop.f32.mrf.mxu0 }
 0x1f8   : > { %v1950_v35 = vpop.f32.mrf.mxu1 }
 0x1f9   : > { %v1951_v36 = vadd.f32 %v1950_v35, %v1875_v29 }
 0x1fa   : > { %v2571_v37 = vpop.f32.mrf.mxu1  ;;  %v2172_v24 = vpop.f32.mrf.mxu0 }
 0x1fb   : > { %v2025_v38 = vadd.f32 %v2024_v27, %v1951_v36 }
 0x1fc   : > { %v2098_v40 = vpop.f32.mrf.mxu1  ;;  %v2586_v31 = vpop.f32.mrf.mxu0 }
 0x1fd   : > { %v2099_v41 = vadd.f32 %v2098_v40, %v2025_v38 }
 0x1fe   : > { %v2581_v33 = vpop.f32.mrf.mxu1 }
 0x1ff   : > { %v2173_v42 = vadd.f32 %v2172_v24, %v2099_v41 }
 0x200   : > { %v2244_v43 = vpop.f32.mrf.mxu1 }
 0x201   : > { %v2245_v44 = vadd.f32 %v2244_v43, %v2173_v42 }
 0x202   : > { %v2591_v50 = vpop.f32.mrf.mxu1 }
 0x203   : > { %v2254_v39 = vadd.f32 %v2252_v49, %v2245_v44 }
 0x205   : > { %2255 = vst [vmem:[%s422_s29] sm:$0xff] %v2254_v39 }
 0x206   : > { %2674 = shalt.err (!%p2671_p5)
}
 0x207   : > { %s2675_s1 = scalar_lea.hbm %s2293_s20, 128  ;;  %s2679_s29 = scalar_lea.hbm %s3007_s7, 256 }
 0x208   : > { %p2676_p6 = scmp.ne.s32.totalorder %s2293_s20, %s2675_s1  ;;  %p2680_p10 = scmp.lt.s32.totalorder %s2293_s20, %s3007_s7 }
 0x209   : > { %p2681_p11 = scmp.lt.s32.totalorder %s2679_s29, %s2675_s1 }
 0x20a   : > { %p2677_p7 = pnand %p2676_p6, %p2839_p4 }
 0x20b   : > { %p2682_p12 = por %p2681_p11, %p2680_p10 }
 0x20c   : > { %p2678_p9 = pneg %p2677_p7 }
 0x20e   : > { %p2683_p13 = pnand %p2682_p12, %p2678_p9 }
 0x210   : > { %2686 = shalt.err (!%p2683_p13)
}
 0x211   : > { %2592 = dma.vmem_to_hbm [thread:$0]  (%p2839_p4), %s2296_s30, 128, %s2293_s20, %s2260_s22  }
 0x212 PF: > { %p2598_p0 = scmp.ge.s32.totalorder %s2737_s18, 2  ;;  %s2316_s0 = sand.u32 1, %s2717_s13  }
 0x213   : > { %s2317_s27 = scalar_lea.sflag [#allocation5], %s2316_s0 }
 0x214   : > { %p2595_p1 = pnand %p2598_p0, %p2846_p8 }
 0x216   : > { %p2596_p2 = pneg %p2595_p1 }
 0x218   : > { %2712 = dma.done.wait (%p2596_p2), %s2317_s27, 128  }
 0x219   : > { %2714 = vsyncadd (%p2596_p2), %s2317_s27, 4294967168  ;;  %s24_s18 = sadd.s32 1, %s2737_s18   ;;  %s3017_s13 = smov %s2721_s14 }
 0x21a   : > { %p21_p3 = scmp.ge.s32.totalorder %s24_s18, 4   ;;  %s3018_s14 = smov %s2725_s15 }
 0x21b   : > { %s3019_s15 = smov %s2852_s26  ;;  %s3020_s16 = smov %s2733_s17 }
 0x21c   : > { %s3021_s17 = smov %s3023_s21  ;;  %23 = sbr.rel (!%p21_p3) target bundleno = 7 (0x7), region = 133 }
 0x221   :  { %2352 = vsyncpa [#allocation5], 1 }
 0x222   :  { %2354 = vsyncpa [#allocation5 + $0x1], 1 }

</bundles_post_ra>
